<compile_context>
chip_gen: v6e
topology: v6e:2x2x1
jax: 0.10.0
libtpu: 0.0.40
codegen_flags: <defaults>
</compile_context>

<pallas_src>
import functools

import jax
import jax.numpy as jnp
from jax.experimental import pallas as pl
from jax.experimental.pallas import tpu as pltpu


def _round_up(x, m):
    return ((x + m - 1) // m) * m


# ---------------------------------------------------------------------------
# Pallas kernel: per-pixel MLP (1x1 conv stack) + optional L2 normalization.
# Channels live on the sublane axis, pixels on the lane axis.
# ---------------------------------------------------------------------------
def _dcn_kernel(x_ref, w1t_ref, b1_ref, w2t_ref, b2_ref, o_ref, *, normalize):
    # x_ref:   (cin, TP)     tile of pixels (lane-dense)
    # w1t_ref: (hidden, cin) pre-transposed weights
    # b1_ref:  (hidden, 1)
    # w2t_ref: (d, hidden)
    # b2_ref:  (d, 1)
    # o_ref:   (d, TP)
    x = x_ref[...]

    h = jnp.dot(w1t_ref[...], x, preferred_element_type=jnp.float32)
    h = h + b1_ref[...]                       # broadcast bias along lanes
    h = jnp.maximum(h, 0.0)

    y = jnp.dot(w2t_ref[...], h, preferred_element_type=jnp.float32)
    y = y + b2_ref[...]

    if normalize:
        # torch.norm(res, 2, 1); res / norm  (per-pixel L2 normalization).
        # NOTE: the literal PyTorch broadcast (N,D,H,W)/(N,H,W) is only
        # well-formed for N == 1; we implement the intended per-pixel
        # normalization, which matches PyTorch exactly in that case.
        d = y.shape[0]
        sq = y * y
        sumsq = sq[0:1, :]
        for i in range(1, d):                 # static unroll over D channel rows
            sumsq = sumsq + sq[i:i + 1, :]
        y = y * jax.lax.rsqrt(sumsq)          # EUP rsqrt, one op, no divide

    o_ref[...] = y.astype(o_ref.dtype)


# ---------------------------------------------------------------------------
# Wrapper: NCHW is kernel-native; only reshapes (no transposes) around the call.
# ---------------------------------------------------------------------------
@functools.partial(jax.jit, static_argnames=("normalize", "pixel_tile"))
def dcn_forward(img_nchw, params, *, normalize=False, pixel_tile=2048):
    """Forward pass of DenseCorrespondenceNetwork.

    img_nchw: (N, 3, H, W) float32
    returns:  (N, D, H, W) float32
    """
    w1, b1, w2, b2 = params
    n, cin, h, w = img_nchw.shape
    hidden = w1.shape[1]
    d = w2.shape[1]
    assert w1.shape[0] == cin
    assert pixel_tile % 128 == 0

    hw = h * w
    # Lane-axis tile: multiple of 128, clamped to (padded) image size.
    tp = min(pixel_tile, _round_up(hw, 128))
    hw_pad = _round_up(hw, tp)

    # NCHW is already (N, C, pixels)-major: just a reshape, no transpose.
    x = img_nchw.reshape(n, cin, hw)
    if hw_pad != hw:
        x = jnp.pad(x, ((0, 0), (0, 0), (0, hw_pad - hw)))

    # Tiny pre-transposed weights / column biases.
    w1t = w1.T                       # (hidden, cin)
    w2t = w2.T                       # (d, hidden)
    b1c = b1.reshape(hidden, 1)
    b2c = b2.reshape(d, 1)

    kernel = functools.partial(_dcn_kernel, normalize=normalize)

    out = pl.pallas_call(
        kernel,
        out_shape=jax.ShapeDtypeStruct((n, d, hw_pad), jnp.float32),
        grid_spec=pltpu.PrefetchScalarGridSpec(
            num_scalar_prefetch=0,
            grid=(n, hw_pad // tp),
            in_specs=[
                pl.BlockSpec((pl.Squeezed(), cin, tp), lambda b, i: (b, 0, i)),
                pl.BlockSpec((hidden, cin), lambda b, i: (0, 0)),
                pl.BlockSpec((hidden, 1), lambda b, i: (0, 0)),
                pl.BlockSpec((d, hidden), lambda b, i: (0, 0)),
                pl.BlockSpec((d, 1), lambda b, i: (0, 0)),
            ],
            out_specs=pl.BlockSpec((pl.Squeezed(), d, tp),
                                   lambda b, i: (b, 0, i)),
        ),
        compiler_params=pltpu.CompilerParams(
            dimension_semantics=("parallel", "parallel")),
    )(x, w1t, b1c, w2t, b2c)

    if hw_pad != hw:
        out = out[:, :, :hw]
    # (N, D, H*W) -> (N, D, H, W): reshape only, matches PyTorch NCHW output.
    return out.reshape(n, d, h, w)


# ---------------------------------------------------------------------------
# Deterministic parameter init for the synthetic fcn backbone.
# ---------------------------------------------------------------------------
def init_params(key, cin=3, hidden=32, d=3):
    k1, k2 = jax.random.split(key)
    w1 = jax.random.normal(k1, (cin, hidden), jnp.float32) * (1.0 / jnp.sqrt(cin))
    b1 = jnp.zeros((hidden,), jnp.float32)
    w2 = jax.random.normal(k2, (hidden, d), jnp.float32) * (1.0 / jnp.sqrt(hidden))
    b2 = jnp.zeros((d,), jnp.float32)
    return w1, b1, w2, b2


if __name__ == "__main__":
    key = jax.random.PRNGKey(0)
    k_img, k_params = jax.random.split(key)

    # Small shapes consistent with the module: batch=2, 3 input (RGB) channels,
    # 16x16 spatial, descriptor_dimension D=3, hidden=32.
    N, CIN, H, W = 2, 3, 16, 16
    D, HIDDEN = 3, 32

    img = jax.random.uniform(k_img, (N, CIN, H, W), jnp.float32)  # [0, 1) image
    params = init_params(k_params, cin=CIN, hidden=HIDDEN, d=D)

    # Module default is normalize=False (forward == fcn(img)); also exercise
    # the normalize path to cover the per-pixel L2-norm branch of forward().
    out = dcn_forward(img, params, normalize=False)
    out_norm = dcn_forward(img, params, normalize=True)
    jax.block_until_ready(out)
    jax.block_until_ready(out_norm)

    assert out.shape == (N, D, H, W)
    assert out_norm.shape == (N, D, H, W)

    # Pure-JAX reference check.
    w1, b1, w2, b2 = params
    x_ref = jnp.transpose(img, (0, 2, 3, 1)).reshape(-1, CIN)
    h_ref = jnp.maximum(x_ref @ w1 + b1, 0.0)
    y_ref = h_ref @ w2 + b2
    ref = y_ref.reshape(N, H, W, D).transpose(0, 3, 1, 2)
    ref_norm = ref / jnp.sqrt(jnp.sum(ref * ref, axis=1, keepdims=True))
    assert jnp.allclose(out, ref, atol=1e-5, rtol=1e-5)
    assert jnp.allclose(out_norm, ref_norm, atol=1e-5, rtol=1e-5)

    print("KERNEL_OK")
</pallas_src>

<mosaic_0001>
module attributes {stable_mosaic.version = 11 : i64} {
  func.func @_dcn_kernel(%arg0: i32, %arg1: i32, %arg2: memref<1x3x256xf32, #tpu.memory_space<vmem>>, %arg3: memref<32x3xf32, #tpu.memory_space<vmem>>, %arg4: memref<32x1xf32, #tpu.memory_space<vmem>>, %arg5: memref<3x32xf32, #tpu.memory_space<vmem>>, %arg6: memref<3x1xf32, #tpu.memory_space<vmem>>, %arg7: memref<1x3x256xf32, #tpu.memory_space<vmem>>) attributes {dimension_semantics = [#tpu.dimension_semantics<parallel>, #tpu.dimension_semantics<parallel>], iteration_bounds = array<i64: 2, 1>, scalar_prefetch = 0 : i64, scratch_operands = 0 : i64, tpu.core_type = #tpu.core_type<tc>, window_params = [{transform_indices = @transform_0, window_bounds = array<i64: 1, 3, 256>}, {pipeline_mode = #tpu.pipeline_mode<synchronous>, transform_indices = @transform_1, window_bounds = array<i64: 32, 3>}, {pipeline_mode = #tpu.pipeline_mode<synchronous>, transform_indices = @transform_2, window_bounds = array<i64: 32, 1>}, {pipeline_mode = #tpu.pipeline_mode<synchronous>, transform_indices = @transform_3, window_bounds = array<i64: 3, 32>}, {pipeline_mode = #tpu.pipeline_mode<synchronous>, transform_indices = @transform_4, window_bounds = array<i64: 3, 1>}, {transform_indices = @transform_5, window_bounds = array<i64: 1, 3, 256>}]} {
    %c0 = arith.constant 0 : index
    %c0_0 = arith.constant 0 : index
    %c0_1 = arith.constant 0 : index
    %0 = vector.load %arg2[%c0, %c0_0, %c0_1] : memref<1x3x256xf32, #tpu.memory_space<vmem>>, vector<1x3x256xf32>
    %1 = vector.shape_cast %0 : vector<1x3x256xf32> to vector<3x256xf32>
    %c0_2 = arith.constant 0 : index
    %c0_3 = arith.constant 0 : index
    %2 = vector.load %arg3[%c0_2, %c0_3] : memref<32x3xf32, #tpu.memory_space<vmem>>, vector<32x3xf32>
    %cst = arith.constant dense<0.000000e+00> : vector<32x256xf32>
    %3 = tpu.matmul %2, %1, %cst {dimension_numbers = #tpu.dot_dimension_numbers<[1], [0], [0], [1], [0, 0, 1, 1], [], []>} : vector<32x3xf32>, vector<3x256xf32>, vector<32x256xf32> -> vector<32x256xf32>
    %c0_4 = arith.constant 0 : index
    %c0_5 = arith.constant 0 : index
    %4 = vector.load %arg4[%c0_4, %c0_5] : memref<32x1xf32, #tpu.memory_space<vmem>>, vector<32x1xf32>
    %5 = vector.broadcast %4 : vector<32x1xf32> to vector<32x256xf32>
    %6 = arith.addf %3, %5 : vector<32x256xf32>
    %cst_6 = arith.constant 0.000000e+00 : f32
    %7 = vector.broadcast %cst_6 : f32 to vector<32x256xf32>
    %8 = arith.maximumf %6, %7 : vector<32x256xf32>
    %c0_7 = arith.constant 0 : index
    %c0_8 = arith.constant 0 : index
    %9 = vector.load %arg5[%c0_7, %c0_8] : memref<3x32xf32, #tpu.memory_space<vmem>>, vector<3x32xf32>
    %cst_9 = arith.constant dense<0.000000e+00> : vector<3x256xf32>
    %10 = tpu.matmul %9, %8, %cst_9 {dimension_numbers = #tpu.dot_dimension_numbers<[1], [0], [0], [1], [0, 0, 1, 1], [], []>} : vector<3x32xf32>, vector<32x256xf32>, vector<3x256xf32> -> vector<3x256xf32>
    %c0_10 = arith.constant 0 : index
    %c0_11 = arith.constant 0 : index
    %11 = vector.load %arg6[%c0_10, %c0_11] : memref<3x1xf32, #tpu.memory_space<vmem>>, vector<3x1xf32>
    %12 = vector.broadcast %11 : vector<3x1xf32> to vector<3x256xf32>
    %13 = arith.addf %10, %12 : vector<3x256xf32>
    %c0_12 = arith.constant 0 : index
    %c0_13 = arith.constant 0 : index
    %c0_14 = arith.constant 0 : index
    %14 = vector.load %arg7[%c0_12, %c0_13, %c0_14] : memref<1x3x256xf32, #tpu.memory_space<vmem>>, vector<1x3x256xf32>
    %15 = vector.shape_cast %14 : vector<1x3x256xf32> to vector<3x256xf32>
    %16 = vector.shape_cast %13 : vector<3x256xf32> to vector<1x3x256xf32>
    tpu.vector_store %arg7[%c0_12, %c0_13, %c0_14], %16 {strides = array<i32>} : memref<1x3x256xf32, #tpu.memory_space<vmem>>, vector<1x3x256xf32>,
    return
  }
  func.func @transform_0(%arg0: i32, %arg1: i32) -> (i32, i32, i32) {
    %c0_i32 = arith.constant 0 : i32
    %c0_i32_0 = arith.constant 0 : i32
    return %arg0, %c0_i32, %arg1 : i32, i32, i32
  }
  func.func @transform_1(%arg0: i32, %arg1: i32) -> (i32, i32) {
    %c0_i32 = arith.constant 0 : i32
    %c0_i32_0 = arith.constant 0 : i32
    %c0_i32_1 = arith.constant 0 : i32
    return %c0_i32, %c0_i32_0 : i32, i32
  }
  func.func @transform_2(%arg0: i32, %arg1: i32) -> (i32, i32) {
    %c0_i32 = arith.constant 0 : i32
    %c0_i32_0 = arith.constant 0 : i32
    %c0_i32_1 = arith.constant 0 : i32
    return %c0_i32, %c0_i32_0 : i32, i32
  }
  func.func @transform_3(%arg0: i32, %arg1: i32) -> (i32, i32) {
    %c0_i32 = arith.constant 0 : i32
    %c0_i32_0 = arith.constant 0 : i32
    %c0_i32_1 = arith.constant 0 : i32
    return %c0_i32, %c0_i32_0 : i32, i32
  }
  func.func @transform_4(%arg0: i32, %arg1: i32) -> (i32, i32) {
    %c0_i32 = arith.constant 0 : i32
    %c0_i32_0 = arith.constant 0 : i32
    %c0_i32_1 = arith.constant 0 : i32
    return %c0_i32, %c0_i32_0 : i32, i32
  }
  func.func @transform_5(%arg0: i32, %arg1: i32) -> (i32, i32, i32) {
    %c0_i32 = arith.constant 0 : i32
    %c0_i32_0 = arith.constant 0 : i32
    return %arg0, %c0_i32, %arg1 : i32, i32, i32
  }
}

</mosaic_0001>

<bundles_post_ra>
// kernel: dcn_forward.1
= control target key start
LH: loop header
LB: loop body
LE: loop exit
PB: predicated region body
PF: predicated region fallthrough
CT: control target
= control target key end

     0   :  { %s689_s18 = smov 0   ;;  %s691_s19 = smov 0   ;;  %s759_s0 = inlined_call_operand.vmem [shape: f32[2,3,256], index: 0, kind: input, shape index: {}]   ;;  %s760_s1 = inlined_call_operand.vmem [shape: f32[32,3], index: 1, kind: input, shape index: {}]   ;;  %s761_s2 = inlined_call_operand.vmem [shape: f32[32,1], index: 2, kind: input, shape index: {}]   ;;  %s762_s3 = inlined_call_operand.vmem [shape: f32[3,32], index: 3, kind: input, shape index: {}]   ;;  %s763_s4 = inlined_call_operand.vmem [shape: f32[3,1], index: 4, kind: input, shape index: {}]   ;;  %s764_s5 = inlined_call_operand.vmem [shape: f32[2,3,256], index: 5, kind: output, shape index: {}]  }
   0x1   :  { %s693_s20 = smov 0  }
   0x2 LB: > { %s27_s21 = sadd.s32 1, %s651_s19  ;;  %p588_p0 = scmp.ge.s32.totalorder %s655_s20, 1  ;;  %s655_s20 = sphi %s693_s20, %s15_s20   ;;  %s651_s19 = sphi %s691_s19, %s766_s19   ;;  %s647_s18 = sphi %s689_s18, %s765_s18  }
   0x3   : > { %p29_p1 = scmp.ge.s32.totalorder %s27_s21, 2  ;;  %p208_p2 = scmp.lt.s32.totalorder %s655_s20, 3 }
   0x5   : > { %s768_s21 = smov (%p29_p1, %s27_s21), 0  ;;  %p209_p3 = pnand %p588_p0, %p208_p2 }
   0x6   : > { %p245_p4 = scmp.lt.s32.totalorder (!%p209_p3), %s647_s18, 1 }
   0x7   : > { %212 = sbr.rel (%p209_p3) target bundleno = 440 (0x1b8), region = 40 }
   0xc   : > { %v657_v0 = vmov 0.0   ;;  %v270_v1 = vld [vmem:[%s761_s2 + $0x8] sm:$0xff]  ;;  %s770_s18 = smov (!%p245_p4, %s647_s18), 1  ;;  %v658_v2 = vmov 0   ;;  %v272_v3 = vld [vmem:[%s761_s2 + $0x18] sm:$0xff]  ;;  %v269_v4 = vld [vmem:[%s761_s2] sm:$0xff] }
   0xd   : > { %377 = vmatprep.mubr.f32.mxu0 %v657_v0  ;;  %485 = vmatprep.mubr.f32.mxu1 %v657_v0  ;;  %s602_s26 = sshll.u32 %s770_s18, 3  ;;  %v271_v5 = vld [vmem:[%s761_s2 + $0x10] sm:$0xff]  ;;  %vm308_vm0 = vcmask 1042432   ;;  %v265_v8 = vld [vmem:[%s760_s1] sm:$0xff]  ;;  %vm295_vm1 = vcmask 23552   ;;  %v266_v10 = vld [vmem:[%s760_s1 + $0x8] sm:$0xff] }
   0xe   : > { %631 = vset.pattern.permute.xlu1 %v658_v2  ;;  %630 = vset.pattern.permute.xlu0 %v658_v2  ;;  %s252_s8 = scalar_lea.vmem %s759_s0, %s602_s26  ;;  %v411_v9 = vld [vmem:[%s763_s4] sm:$0x7]  ;;  %v267_v11 = vld [vmem:[%s760_s1 + $0x10] sm:$0xff]  ;;  %v268_v12 = vld [vmem:[%s760_s1 + $0x18] sm:$0xff]  ;;  %vm417_vm2 = vcmask 261120   ;;  %s262_s28 = scalar_lea.vmem %s764_s5, %s602_s26 }
   0xf   : > { %280 = vperm.xlu1 %631, %v270_v1   ;;  %290 = vperm.xlu0 %630, %v272_v3   ;;  %v264_v6 = vld [vmem:[%s252_s8] sm:$0x77] }
  0x10   : > { %v294_v7 = vcombine.high %v264_v6, %v264_v6  ;;  %v410_v41 = vld [vmem:[%s762_s3] sm:$0x7] }
  0x12   : > { %593 = vmatprep.subr.msk.mxu0 %vm308_vm0, %v294_v7 }
  0x13   : > { %275 = vperm.xlu1 %631, %v269_v4   ;;  %285 = vperm.xlu0 %630, %v271_v5  }
  0x14   : > { %594 = vmatpush1.msk.msra.mxu0 %vm308_vm0, %v264_v6 }
  0x15   : > { %595 = vmatmul.mubr.msk.f32.vlgmr.msra.gmra.mxu0 %vm295_vm1, %v265_v8 }
  0x16   : > { %383 = vmatprep.mubr.f32.mxu0 %v657_v0 }
  0x17   : > { %414 = vperm.xlu0 %630, %v411_v9  }
  0x19   : > { %596 = vmatmul.mubr.msk.f32.gmra.mxu0 %vm295_vm1, %v266_v10 }
  0x1a   : > { %389 = vmatprep.mubr.f32.mxu0 %v657_v0 }
  0x1d   : > { %597 = vmatmul.mubr.msk.f32.gmra.mxu0 %vm295_vm1, %v267_v11 }
  0x1e   : > { %395 = vmatprep.mubr.f32.mxu0 %v657_v0 }
  0x21   : > { %598 = vmatmul.mubr.msk.f32.gmra.mxu0 %vm295_vm1, %v268_v12 }
  0x8a   : > { %v291_v17 = vpop.permute.xlu0 %290  ;;  %v281_v20 = vpop.permute.xlu1 %280 }
  0x8e   : > { %v286_v22 = vpop.permute.xlu0 %285  ;;  %v276_v28 = vpop.permute.xlu1 %275 }
  0x92   : > { %v415_v43 = vpop.permute.xlu0 %414 }
  0xd5   : > { %v379_v13 = vpop.f32.mrf.mxu0 }
  0xd6   : > { %v380_v35 = vadd.f32 %v379_v13, %v276_v28 }
  0xd7   : > { %v381_v14 = vpop.f32.mrf.mxu0 }
  0xd8   : > { %v382_v33 = vadd.f32 %v381_v14, %v276_v28  ;;  %v402_v40 = vmax.f32 %v380_v35, 0.0 }
  0xd9   : > { %v385_v15 = vpop.f32.mrf.mxu0 }
  0xda   : > { %v386_v31 = vadd.f32 %v385_v15, %v281_v20  ;;  %v403_v39 = vmax.f32 %v382_v33, 0.0 }
  0xdb   : > { %v387_v16 = vpop.f32.mrf.mxu0 }
  0xdc   : > { %v388_v29 = vadd.f32 %v387_v16, %v281_v20  ;;  %v404_v38 = vmax.f32 %v386_v31, 0.0 }
  0xdd   : > { %v391_v18 = vpop.f32.mrf.mxu0 }
  0xde   : > { %v392_v27 = vadd.f32 %v391_v18, %v286_v22  ;;  %v405_v37 = vmax.f32 %v388_v29, 0.0 }
  0xdf   : > { %v393_v19 = vpop.f32.mrf.mxu0 }
  0xe0   : > { %v394_v25 = vadd.f32 %v393_v19, %v286_v22  ;;  %v406_v36 = vmax.f32 %v392_v27, 0.0 }
  0xe1   : > { %v397_v21 = vpop.f32.mrf.mxu0 }
  0xe2   : > { %v398_v23 = vadd.f32 %v397_v21, %v291_v17  ;;  %v407_v34 = vmax.f32 %v394_v25, 0.0 }
  0xe3   : > { %v399_v24 = vpop.f32.mrf.mxu0 }
  0xe4   : > { %v400_v26 = vadd.f32 %v399_v24, %v291_v17  ;;  %v408_v32 = vmax.f32 %v398_v23, 0.0 }
  0xe6   : > { %v409_v30 = vmax.f32 %v400_v26, 0.0 }
  0xe8   : > { %445 = vmatprep.subr.mxu1 %v409_v30 }
  0xe9   : > { %446 = vmatpush1.msra.mxu1 %v408_v32 }
  0xea   : > { %447 = vmatprep.subr.mxu1 %v407_v34 }
  0xeb   : > { %448 = vmatpush1.msra.mxu1 %v406_v36 }
  0xec   : > { %449 = vmatprep.subr.mxu1 %v405_v37 }
  0xed   : > { %450 = vmatpush1.msra.mxu1 %v404_v38 }
  0xee   : > { %451 = vmatprep.subr.mxu1 %v403_v39 }
  0xef   : > { %452 = vmatpush1.msra.mxu1 %v402_v40 }
  0xf0   : > { %599 = vmatmul.mubr.msk.f32.vlgmr.msra.gmra.mxu1 %vm417_vm2, %v410_v41 }
 0x1b0   : > { %v487_v42 = vpop.f32.mrf.mxu1 }
 0x1b1   : > { %v488_v45 = vadd.f32 %v487_v42, %v415_v43 }
 0x1b2   : > { %v489_v44 = vpop.f32.mrf.mxu1 }
 0x1b3   : > { %v490_v46 = vadd.f32 %v489_v44, %v415_v43 }
 0x1b5   : > { %v494_v47 = vcombine.low %v488_v45, %v490_v46 }
 0x1b7   : > { %496 = vst [vmem:[%s262_s28] sm:$0x77] %v494_v47 }
 0x1b8 PF: > { %s15_s20 = sadd.s32 1, %s655_s20   ;;  %s765_s18 = smov %s651_s19 }
 0x1b9   : > { %p12_p5 = scmp.ge.s32.totalorder %s15_s20, 4   ;;  %s766_s19 = smov %s768_s21 }
 0x1bb   :  { %14 = sbr.rel (!%p12_p5) target bundleno = 2 (0x2), region = 70 }

</bundles_post_ra>
